<compile_context>
chip_gen: v6e
topology: v6e:2x2x1
jax: 0.10.0
libtpu: 0.0.40
codegen_flags: <defaults>
</compile_context>

<pallas_src>
import functools

import jax
import jax.numpy as jnp
from jax.experimental import pallas as pl
from jax.experimental.pallas import tpu as pltpu

LAMBDA = {
    "reconstruction_out": 1.0,
    "reconstruction_structure": 1.0,
    "reconstruction_texture": 1.0,
}

_LANE = 128
_SUBLANE = 8

# Whole-array (grid-less) path: keep all six operands resident in VMEM.
_DIRECT_MAX_INPUT_BYTES = 24 * 1024 * 1024   # total bytes of the 6 inputs
_DIRECT_VMEM_LIMIT = 32 * 1024 * 1024        # safe on v5e / v6e / v7x

# Streaming fallback for very large inputs.
_STREAM_TILE_ROWS = 2048                     # (2048, 128) f32 = 1 MiB / block
_STREAM_MIN_TILES_FOR_SPLIT = 8              # gate the v7x 2-TC split on work
_STREAM_NUM_CORES = 2


def _cdiv(a, b):
    return -(-a // b)


def _round_up(a, b):
    return _cdiv(a, b) * b


def _to_lane_major(x):
    """Flatten to (rows, 128), zero-padding the tail (|0-0| contributes 0)."""
    xf = x.reshape(-1)
    pad = (-xf.size) % _LANE
    if pad:
        xf = jnp.pad(xf, (0, pad))
    return xf.reshape(-1, _LANE)


# ---------------------------------------------------------------------------
# Primary path: one grid-less launch, everything resident in VMEM.
# ---------------------------------------------------------------------------
def _direct_kernel(w_ref, a0_ref, b0_ref, a1_ref, b1_ref, a2_ref, b2_ref, o_ref):
    """o = sum_p  w[p] * sum(|a_p - b_p|)   written as a (1,1) f32."""

    def wterm(idx, a_ref, b_ref):
        d = jnp.abs(a_ref[...].astype(jnp.float32) - b_ref[...].astype(jnp.float32))
        # Sublane-direction fold first (cheap VPU adds), then one lane reduce.
        col = jnp.sum(d, axis=0, keepdims=True)                 # (1, 128)
        return w_ref[idx] * jnp.sum(col, axis=1, keepdims=True)  # (1, 1)

    o_ref[...] = (wterm(0, a0_ref, b0_ref)
                  + wterm(1, a1_ref, b1_ref)
                  + wterm(2, a2_ref, b2_ref))


def _direct_total(pairs, weights):
    w = jnp.stack([jnp.asarray(x, jnp.float32) for x in weights])
    flats = []
    for a, b in pairs:
        flats.append(_to_lane_major(a))
        flats.append(_to_lane_major(b))

    out = pl.pallas_call(
        _direct_kernel,
        out_shape=jax.ShapeDtypeStruct((1, 1), jnp.float32),
        in_specs=[pl.BlockSpec(memory_space=pltpu.MemorySpace.SMEM)]
        + [pl.BlockSpec(memory_space=pltpu.MemorySpace.VMEM)] * 6,
        out_specs=pl.BlockSpec(memory_space=pltpu.MemorySpace.VMEM),
        compiler_params=pltpu.CompilerParams(vmem_limit_bytes=_DIRECT_VMEM_LIMIT),
    )(w, *flats)
    return out[0, 0]


# ---------------------------------------------------------------------------
# Streaming fallback for large inputs (per pair, no slab repack).
# ---------------------------------------------------------------------------
def _stream_l1_kernel(a_ref, b_ref, o_ref):
    """Accumulate sum(|a-b|) into a resident (1, 8, 128) output block."""
    i = pl.program_id(1)

    @pl.when(i == 0)
    def _():
        o_ref[...] = jnp.zeros_like(o_ref)

    d = jnp.abs(a_ref[...].astype(jnp.float32) - b_ref[...].astype(jnp.float32))
    # Fold the tall (tile_rows, 128) tile to one vreg with elementwise adds.
    o_ref[0] += jnp.sum(d.reshape(-1, _SUBLANE, _LANE), axis=0)


def _streaming_l1_sum(a, b):
    """sum(|a - b|) over all elements, streamed through VMEM tiles."""
    rows = _cdiv(a.size, _LANE)
    tile_rows = min(_STREAM_TILE_ROWS, _round_up(rows, _SUBLANE))
    n_tiles = _cdiv(rows, tile_rows)
    cores = _STREAM_NUM_CORES if n_tiles >= _STREAM_MIN_TILES_FOR_SPLIT else 1
    total_tiles = _round_up(n_tiles, cores)
    tiles_per_core = total_tiles // cores
    rows_padded = total_tiles * tile_rows

    def pad_rows(x):
        xf = x.reshape(-1)
        pad = rows_padded * _LANE - xf.size
        if pad:
            xf = jnp.pad(xf, (0, pad))
        return xf.reshape(rows_padded, _LANE)

    a2 = pad_rows(a)
    b2 = pad_rows(b)

    partials = pl.pallas_call(
        _stream_l1_kernel,
        out_shape=jax.ShapeDtypeStruct((cores, _SUBLANE, _LANE), jnp.float32),
        grid_spec=pltpu.PrefetchScalarGridSpec(
            num_scalar_prefetch=0,
            grid=(cores, tiles_per_core),
            in_specs=[
                pl.BlockSpec((tile_rows, _LANE),
                             lambda c, i: (c * tiles_per_core + i, 0)),
                pl.BlockSpec((tile_rows, _LANE),
                             lambda c, i: (c * tiles_per_core + i, 0)),
            ],
            out_specs=pl.BlockSpec((1, _SUBLANE, _LANE), lambda c, i: (c, 0, 0)),
        ),
        compiler_params=pltpu.CompilerParams(
            dimension_semantics=("parallel", "arbitrary"),
        ),
    )(a2, b2)
    # The tiny reduce over (cores, 8, 128) only runs on the large-input path,
    # where it is negligible relative to the streamed HBM traffic.
    return jnp.sum(partials)


# ---------------------------------------------------------------------------
# Public entry point (same semantics as TotalLoss.forward with ENABLED flags).
# ---------------------------------------------------------------------------
@functools.partial(jax.jit, static_argnames=("force_streaming",))
def total_loss(
    i_gt_small,
    i_st,
    i_ost,
    i_ote,
    i_gt_large,
    i_out_large,
    i_gt_sliced,   # unused: adversarial loss disabled in ENABLED
    i_out_sliced,  # unused: adversarial loss disabled in ENABLED
    mask_size,
    *,
    force_streaming=False,
):
    mask_size = jnp.asarray(mask_size, jnp.float32)

    pairs = [
        (i_out_large, i_gt_large),   # reconstruction_out
        (i_ost, i_st),               # reconstruction_structure
        (i_ote, i_gt_small),         # reconstruction_texture
    ]
    # Per-element weights so that  w * sum(|a-b|) == lambda * mean(|a-b|) * scale
    # (256*256 is hard-coded in the PyTorch module).
    weights = [
        LAMBDA["reconstruction_out"]
        * (256.0 * 256.0 / mask_size) / jnp.float32(i_out_large.size),
        jnp.float32(LAMBDA["reconstruction_structure"] / i_ost.size),
        jnp.float32(LAMBDA["reconstruction_texture"] / i_ote.size),
    ]

    # TODO(synk): style / perceptual (VGG16 features) and adversarial (WGAN
    # discriminators) branches are disabled by ENABLED and not implemented.

    total_bytes = sum(a.size * a.dtype.itemsize + b.size * b.dtype.itemsize
                      for a, b in pairs)
    if force_streaming or total_bytes > _DIRECT_MAX_INPUT_BYTES:
        terms = [w * _streaming_l1_sum(a, b) for (a, b), w in zip(pairs, weights)]
        return terms[0] + terms[1] + terms[2]
    return _direct_total(pairs, weights)


if __name__ == "__main__":
    key = jax.random.PRNGKey(0)
    ks = jax.random.split(key, 8)

    # Small shapes consistent with the module's interface (NCHW).
    small = (2, 3, 16, 16)   # i_gt_small / i_st / i_ost / i_ote
    large = (2, 3, 64, 64)   # i_gt_large / i_out_large
    sliced = (2, 3, 8, 8)    # i_gt_sliced / i_out_sliced (unused path)

    i_gt_small = jax.random.normal(ks[0], small, jnp.float32)
    i_st = jax.random.normal(ks[1], small, jnp.float32)
    i_ost = jax.random.normal(ks[2], small, jnp.float32)
    i_ote = jax.random.normal(ks[3], small, jnp.float32)
    i_gt_large = jax.random.normal(ks[4], large, jnp.float32)
    i_out_large = jax.random.normal(ks[5], large, jnp.float32)
    i_gt_sliced = jax.random.normal(ks[6], sliced, jnp.float32)
    i_out_sliced = jax.random.normal(ks[7], sliced, jnp.float32)
    mask_size = jnp.float32(8 * 8)

    # Reference in plain JAX (same semantics as torch L1Loss 'mean').
    ref = (
        jnp.mean(jnp.abs(i_out_large - i_gt_large)) * (256.0 * 256.0 / mask_size)
        + jnp.mean(jnp.abs(i_ost - i_st))
        + jnp.mean(jnp.abs(i_ote - i_gt_small))
    )

    # Primary (fused, grid-less) path.
    out = total_loss(
        i_gt_small, i_st, i_ost, i_ote,
        i_gt_large, i_out_large,
        i_gt_sliced, i_out_sliced,
        mask_size,
    )
    out = jax.block_until_ready(out)
    assert jnp.allclose(out, ref, rtol=1e-4, atol=1e-4), (out, ref)

    # Also exercise the streaming fallback used for very large inputs.
    out_stream = total_loss(
        i_gt_small, i_st, i_ost, i_ote,
        i_gt_large, i_out_large,
        i_gt_sliced, i_out_sliced,
        mask_size,
        force_streaming=True,
    )
    out_stream = jax.block_until_ready(out_stream)
    assert jnp.allclose(out_stream, ref, rtol=1e-4, atol=1e-4), (out_stream, ref)

    print("KERNEL_OK")
</pallas_src>

<mosaic_0001>
module attributes {stable_mosaic.version = 11 : i64} {
  func.func @_direct_kernel(%arg0: memref<3xf32, #tpu.memory_space<smem>>, %arg1: memref<192x128xf32, #tpu.memory_space<vmem>>, %arg2: memref<192x128xf32, #tpu.memory_space<vmem>>, %arg3: memref<12x128xf32, #tpu.memory_space<vmem>>, %arg4: memref<12x128xf32, #tpu.memory_space<vmem>>, %arg5: memref<12x128xf32, #tpu.memory_space<vmem>>, %arg6: memref<12x128xf32, #tpu.memory_space<vmem>>, %arg7: memref<1x1xf32, #tpu.memory_space<vmem>>) attributes {dimension_semantics = [], scalar_prefetch = 0 : i64, scratch_operands = 0 : i64, tpu.core_type = #tpu.core_type<tc>} {
    %c0 = arith.constant 0 : index
    %c0_0 = arith.constant 0 : index
    %0 = vector.load %arg1[%c0, %c0_0] : memref<192x128xf32, #tpu.memory_space<vmem>>, vector<192x128xf32>
    %c0_1 = arith.constant 0 : index
    %c0_2 = arith.constant 0 : index
    %1 = vector.load %arg2[%c0_1, %c0_2] : memref<192x128xf32, #tpu.memory_space<vmem>>, vector<192x128xf32>
    %2 = arith.subf %0, %1 : vector<192x128xf32>
    %3 = math.absf %2 : vector<192x128xf32>
    %cst = arith.constant dense<0.000000e+00> : vector<128xf32>
    %4 = vector.multi_reduction <add>, %3, %cst [0] : vector<192x128xf32> to vector<128xf32>
    %5 = vector.shape_cast %4 : vector<128xf32> to vector<1x128xf32>
    %c0_3 = arith.constant 0 : index
    %6 = memref.load %arg0[%c0_3] : memref<3xf32, #tpu.memory_space<smem>>
    %cst_4 = arith.constant dense<0.000000e+00> : vector<1xf32>
    %7 = vector.multi_reduction <add>, %5, %cst_4 [1] : vector<1x128xf32> to vector<1xf32>
    %8 = vector.shape_cast %7 : vector<1xf32> to vector<1x1xf32>
    %9 = vector.broadcast %6 : f32 to vector<1x1xf32>
    %10 = arith.mulf %9, %8 : vector<1x1xf32>
    %c0_5 = arith.constant 0 : index
    %c0_6 = arith.constant 0 : index
    %11 = vector.load %arg3[%c0_5, %c0_6] : memref<12x128xf32, #tpu.memory_space<vmem>>, vector<12x128xf32>
    %c0_7 = arith.constant 0 : index
    %c0_8 = arith.constant 0 : index
    %12 = vector.load %arg4[%c0_7, %c0_8] : memref<12x128xf32, #tpu.memory_space<vmem>>, vector<12x128xf32>
    %13 = arith.subf %11, %12 : vector<12x128xf32>
    %14 = math.absf %13 : vector<12x128xf32>
    %cst_9 = arith.constant dense<0.000000e+00> : vector<128xf32>
    %15 = vector.multi_reduction <add>, %14, %cst_9 [0] : vector<12x128xf32> to vector<128xf32>
    %16 = vector.shape_cast %15 : vector<128xf32> to vector<1x128xf32>
    %c1 = arith.constant 1 : index
    %17 = memref.load %arg0[%c1] : memref<3xf32, #tpu.memory_space<smem>>
    %cst_10 = arith.constant dense<0.000000e+00> : vector<1xf32>
    %18 = vector.multi_reduction <add>, %16, %cst_10 [1] : vector<1x128xf32> to vector<1xf32>
    %19 = vector.shape_cast %18 : vector<1xf32> to vector<1x1xf32>
    %20 = vector.broadcast %17 : f32 to vector<1x1xf32>
    %21 = arith.mulf %20, %19 : vector<1x1xf32>
    %22 = arith.addf %10, %21 : vector<1x1xf32>
    %c0_11 = arith.constant 0 : index
    %c0_12 = arith.constant 0 : index
    %23 = vector.load %arg5[%c0_11, %c0_12] : memref<12x128xf32, #tpu.memory_space<vmem>>, vector<12x128xf32>
    %c0_13 = arith.constant 0 : index
    %c0_14 = arith.constant 0 : index
    %24 = vector.load %arg6[%c0_13, %c0_14] : memref<12x128xf32, #tpu.memory_space<vmem>>, vector<12x128xf32>
    %25 = arith.subf %23, %24 : vector<12x128xf32>
    %26 = math.absf %25 : vector<12x128xf32>
    %cst_15 = arith.constant dense<0.000000e+00> : vector<128xf32>
    %27 = vector.multi_reduction <add>, %26, %cst_15 [0] : vector<12x128xf32> to vector<128xf32>
    %28 = vector.shape_cast %27 : vector<128xf32> to vector<1x128xf32>
    %c2 = arith.constant 2 : index
    %29 = memref.load %arg0[%c2] : memref<3xf32, #tpu.memory_space<smem>>
    %cst_16 = arith.constant dense<0.000000e+00> : vector<1xf32>
    %30 = vector.multi_reduction <add>, %28, %cst_16 [1] : vector<1x128xf32> to vector<1xf32>
    %31 = vector.shape_cast %30 : vector<1xf32> to vector<1x1xf32>
    %32 = vector.broadcast %29 : f32 to vector<1x1xf32>
    %33 = arith.mulf %32, %31 : vector<1x1xf32>
    %34 = arith.addf %22, %33 : vector<1x1xf32>
    %c0_17 = arith.constant 0 : index
    %c0_18 = arith.constant 0 : index
    %35 = vector.load %arg7[%c0_17, %c0_18] : memref<1x1xf32, #tpu.memory_space<vmem>>, vector<1x1xf32>
    tpu.vector_store %arg7[%c0_17, %c0_18], %34 {strides = array<i32>} : memref<1x1xf32, #tpu.memory_space<vmem>>, vector<1x1xf32>,
    return
  }
}

</mosaic_0001>

<bundles_post_ra>
// kernel: total_loss.1
= control target key start
LH: loop header
LB: loop body
LE: loop exit
PB: predicated region body
PF: predicated region fallthrough
CT: control target
= control target key end

     0   :  { %12 = vsyncpa [#allocation4], 0  ;;  %s490_s0 = inlined_call_operand.vmem [shape: f32[3], index: 0, kind: input, shape index: {}]   ;;  %s491_s1 = inlined_call_operand.vmem [shape: f32[192,128], index: 1, kind: input, shape index: {}]   ;;  %s492_s2 = inlined_call_operand.vmem [shape: f32[192,128], index: 2, kind: input, shape index: {}]   ;;  %s493_s3 = inlined_call_operand.vmem [shape: f32[12,128], index: 3, kind: input, shape index: {}]   ;;  %s494_s4 = inlined_call_operand.vmem [shape: f32[12,128], index: 4, kind: input, shape index: {}]   ;;  %s495_s5 = inlined_call_operand.vmem [shape: f32[12,128], index: 5, kind: input, shape index: {}]   ;;  %s496_s6 = inlined_call_operand.vmem [shape: f32[12,128], index: 6, kind: input, shape index: {}]   ;;  %s497_s7 = inlined_call_operand.hbm [shape: f32[1,1], index: 7, kind: output, shape index: {}]  }
   0x1   :  { %13 = vsyncpa [#allocation3], 0  ;;  %s20_s26 = sshll.u32 %s490_s0, 4  ;;  %s21_s26 = int_to_ptr.vmem [resolvable:$true] %s20_s26 }
   0x2   :  { %s236_s27 = scalar_lea.vmem %s21_s26, 16  ;;  %p241_p1 = scmp.lt.s32.totalorder %s21_s26, %s21_s26 }
   0x3   :  { %p237_p0 = scmp.ne.s32.totalorder %s21_s26, %s236_s27  ;;  %p242_p2 = scmp.lt.s32.totalorder %s236_s27, %s236_s27 }
   0x5   :  { %p243_p3 = por %p242_p2, %p241_p1 }
   0x7   :  { %p244_p4 = pnand %p243_p3, %p237_p0 }
   0x9   :  { %247 = shalt.err (!%p244_p4)
}
   0xa   :  { %s272_s28 = smov [#allocation2]  }
   0xb   :  { %23 = dma.vmem_to_smem %s21_s26, 16, %s272_s28, [#allocation4]  }
   0xc   :  { %268 = dma.done.wait [#allocation4], 16  }
   0xd   :  { %269 = vsyncadd [#allocation4], 4294967280 }
   0xe   :  { %39 = sfence }
   0xf   :  { %v40_v0 = vld [vmem:[%s491_s1] sm:$0xff]  ;;  %v41_v1 = vld [vmem:[%s491_s1 + $0x8] sm:$0xff]  ;;  %v42_v2 = vld [vmem:[%s491_s1 + $0x10] sm:$0xff]  ;;  %vm178_vm0 = vcmask 1043456   ;;  %s233_s13 = sld [smem:[#allocation2 + $0x2]]  ;;  %s273_s14 = smov [#allocation5]  }
  0x10   :  { %v64_v3 = vld [vmem:[%s492_s2] sm:$0xff]  ;;  %v65_v4 = vld [vmem:[%s492_s2 + $0x8] sm:$0xff]  ;;  %v66_v5 = vld [vmem:[%s492_s2 + $0x10] sm:$0xff]  ;;  %s223_s15 = sshll.u32 %s273_s14, 4  ;;  %vm215_vm1 = vcmask 0   ;;  %s224_s15 = int_to_ptr.vmem [resolvable:$true] %s223_s15 }
  0x11   :  { %v88_v6 = vsub.f32 %v40_v0, %v64_v3  ;;  %v89_v7 = vsub.f32 %v41_v1, %v65_v4  ;;  %v43_v8 = vld [vmem:[%s491_s1 + $0x18] sm:$0xff]  ;;  %v90_v10 = vsub.f32 %v42_v2, %v66_v5  ;;  %v44_v11 = vld [vmem:[%s491_s1 + $0x20] sm:$0xff]  ;;  %v45_v16 = vld [vmem:[%s491_s1 + $0x28] sm:$0xff]  ;;  %s248_s16 = scalar_lea.vmem %s224_s15, 16  ;;  %s252_s17 = scalar_lea.vmem %s224_s15, 32 }
  0x12   :  { %v67_v9 = vld [vmem:[%s492_s2 + $0x18] sm:$0xff]  ;;  %v68_v12 = vld [vmem:[%s492_s2 + $0x20] sm:$0xff]  ;;  %v69_v17 = vld [vmem:[%s492_s2 + $0x28] sm:$0xff]  ;;  %p249_p5 = scmp.ne.s32.totalorder %s224_s15, %s248_s16  ;;  %p253_p6 = scmp.lt.s32.totalorder %s224_s15, %s224_s15 }
  0x13   :  { %v91_v13 = vsub.f32 %v43_v8, %v67_v9  ;;  %v112_v14 = vand.u32 2147483647, %v88_v6  ;;  %v113_v15 = vand.u32 2147483647, %v89_v7  ;;  %v92_v18 = vsub.f32 %v44_v11, %v68_v12  ;;  %v46_v20 = vld [vmem:[%s491_s1 + $0x30] sm:$0xff]  ;;  %v47_v25 = vld [vmem:[%s491_s1 + $0x38] sm:$0xff]  ;;  %p254_p7 = scmp.lt.s32.totalorder %s252_s17, %s248_s16 }
  0x14   :  { %v114_v19 = vand.u32 2147483647, %v90_v10  ;;  %v70_v21 = vld [vmem:[%s492_s2 + $0x30] sm:$0xff]  ;;  %v93_v22 = vsub.f32 %v45_v16, %v69_v17  ;;  %v71_v26 = vld [vmem:[%s492_s2 + $0x38] sm:$0xff]  ;;  %v48_v30 = vld [vmem:[%s491_s1 + $0x40] sm:$0xff] }
  0x15   :  { %v115_v23 = vand.u32 2147483647, %v91_v13  ;;  %v136_v24 = vadd.f32 %v113_v15, %v112_v14  ;;  %v94_v27 = vsub.f32 %v46_v20, %v70_v21  ;;  %v116_v28 = vand.u32 2147483647, %v92_v18  ;;  %v72_v31 = vld [vmem:[%s492_s2 + $0x40] sm:$0xff]  ;;  %v49_v35 = vld [vmem:[%s491_s1 + $0x48] sm:$0xff]  ;;  %p255_p8 = por %p254_p7, %p253_p6 }
  0x16   :  { %v95_v32 = vsub.f32 %v47_v25, %v71_v26  ;;  %v117_v33 = vand.u32 2147483647, %v93_v22  ;;  %v73_v36 = vld [vmem:[%s492_s2 + $0x48] sm:$0xff]  ;;  %v50_v37 = vld [vmem:[%s491_s1 + $0x50] sm:$0xff]  ;;  %v96_v38 = vsub.f32 %v48_v30, %v72_v31  ;;  %v193_v41 = vld [vmem:[%s495_s5] sm:$0xff] }
  0x17   :  { %v137_v29 = vadd.f32 %v136_v24, %v114_v19  ;;  %v118_v39 = vand.u32 2147483647, %v94_v27  ;;  %v195_v42 = vld [vmem:[%s496_s6] sm:$0xff]  ;;  %v74_v43 = vld [vmem:[%s492_s2 + $0x50] sm:$0xff]  ;;  %v194_v44 = vld [vmem:[%s495_s5 + $0x8] sm:$0xf]  ;;  %v97_v47 = vsub.f32 %v49_v35, %v73_v36  ;;  %p256_p9 = pnand %p255_p8, %p249_p5 }
  0x18   :  { %v196_v45 = vld [vmem:[%s496_s6 + $0x8] sm:$0xf]  ;;  %v197_v46 = vsub.f32 %v193_v41, %v195_v42  ;;  %v119_v48 = vand.u32 2147483647, %v95_v32  ;;  %v51_v51 = vld [vmem:[%s491_s1 + $0x58] sm:$0xff]  ;;  %v98_v54 = vsub.f32 %v50_v37, %v74_v43  ;;  %v52_v58 = vld [vmem:[%s491_s1 + $0x60] sm:$0xff] }
  0x19   :  { %v138_v34 = vadd.f32 %v137_v29, %v115_v23  ;;  %v198_v50 = vsub.f32 %v194_v44, %v196_v45  ;;  %v75_v52 = vld [vmem:[%s492_s2 + $0x58] sm:$0xff]  ;;  %v120_v55 = vand.u32 2147483647, %v96_v38  ;;  %v76_v59 = vld [vmem:[%s492_s2 + $0x60] sm:$0xff]  ;;  %v121_v61 = vand.u32 2147483647, %v97_v47 }
  0x1a   :  { %v199_v53 = vand.u32 2147483647, %v197_v46  ;;  %v99_v60 = vsub.f32 %v51_v51, %v75_v52  ;;  %v53_v0 = vld [vmem:[%s491_s1 + $0x68] sm:$0xff]  ;;  %v100_v3 = vsub.f32 %v52_v58, %v76_v59  ;;  %v122_v4 = vand.u32 2147483647, %v98_v54  ;;  %v54_v6 = vld [vmem:[%s491_s1 + $0x70] sm:$0xff] }
  0x1b   :  { %v139_v40 = vadd.f32 %v138_v34, %v116_v28  ;;  %v200_v57 = vand.u32 2147483647, %v198_v50  ;;  %v77_v1 = vld [vmem:[%s492_s2 + $0x68] sm:$0xff]  ;;  %v78_v7 = vld [vmem:[%s492_s2 + $0x70] sm:$0xff]  ;;  %v55_v12 = vld [vmem:[%s491_s1 + $0x78] sm:$0xff] }
  0x1c   :  { %v101_v9 = vsub.f32 %v53_v0, %v77_v1  ;;  %v123_v10 = vand.u32 2147483647, %v99_v60  ;;  %v79_v13 = vld [vmem:[%s492_s2 + $0x78] sm:$0xff]  ;;  %v102_v15 = vsub.f32 %v54_v6, %v78_v7  ;;  %v124_v16 = vand.u32 2147483647, %v100_v3  ;;  %v56_v18 = vld [vmem:[%s491_s1 + $0x80] sm:$0xff] }
  0x1d   :  { %v140_v49 = vadd.f32 %v139_v40, %v117_v33  ;;  %v201_v63 = vsel %vm178_vm0, %v200_v57, 0.0  ;;  %v80_v19 = vld [vmem:[%s492_s2 + $0x80] sm:$0xff]  ;;  %v103_v21 = vsub.f32 %v55_v12, %v79_v13  ;;  %v171_v24 = vld [vmem:[%s493_s3 + $0x8] sm:$0xf]  ;;  %v58_v29 = vld [vmem:[%s491_s1 + $0x90] sm:$0xff] }
  0x1e   :  { %v202_v2 = vadd.f32 %v201_v63, %v199_v53  ;;  %v125_v22 = vand.u32 2147483647, %v101_v9  ;;  %v173_v25 = vld [vmem:[%s494_s4 + $0x8] sm:$0xf]  ;;  %v104_v30 = vsub.f32 %v56_v18, %v80_v19  ;;  %v126_v31 = vand.u32 2147483647, %v102_v15 }
  0x1f   :  { %v141_v56 = vadd.f32 %v140_v49, %v118_v39  ;;  %v57_v26 = vld [vmem:[%s491_s1 + $0x88] sm:$0xff]  ;;  %v82_v33 = vld [vmem:[%s492_s2 + $0x90] sm:$0xff]  ;;  %v170_v34 = vld [vmem:[%s493_s3] sm:$0xff]  ;;  %v175_v36 = vsub.f32 %v171_v24, %v173_v25  ;;  %v127_v39 = vand.u32 2147483647, %v103_v21 }
  0x20   :  { %v203_v8 = vrot.slane %v202_v2, 4  ;;  %v81_v27 = vld [vmem:[%s492_s2 + $0x88] sm:$0xff]  ;;  %v172_v35 = vld [vmem:[%s494_s4] sm:$0xff]  ;;  %v59_v41 = vld [vmem:[%s491_s1 + $0x98] sm:$0xff]  ;;  %v106_v44 = vsub.f32 %v58_v29, %v82_v33  ;;  %v128_v45 = vand.u32 2147483647, %v104_v30 }
  0x21   :  { %v142_v62 = vadd.f32 %v141_v56, %v119_v48  ;;  %v105_v38 = vsub.f32 %v57_v26, %v81_v27  ;;  %v83_v42 = vld [vmem:[%s492_s2 + $0x98] sm:$0xff]  ;;  %v174_v47 = vsub.f32 %v170_v34, %v172_v35  ;;  %v60_v48 = vld [vmem:[%s491_s1 + $0xa0] sm:$0xff]  ;;  %v177_v50 = vand.u32 2147483647, %v175_v36  ;;  %v61_v54 = vld [vmem:[%s491_s1 + $0xa8] sm:$0xff] }
  0x22   :  { %v204_v14 = vadd.f32 %v203_v8, %v202_v2  ;;  %v84_v49 = vld [vmem:[%s492_s2 + $0xa0] sm:$0xff]  ;;  %v107_v51 = vsub.f32 %v59_v41, %v83_v42  ;;  %v130_v57 = vand.u32 2147483647, %v106_v44  ;;  %v62_v60 = vld [vmem:[%s491_s1 + $0xb0] sm:$0xff]  ;;  %v63_v2 = vld [vmem:[%s491_s1 + $0xb8] sm:$0xff]  ;;  %s165_s1 = sld [smem:[#allocation2]] }
  0x23   :  { %v143_v5 = vadd.f32 %v142_v62, %v120_v55  ;;  %v129_v52 = vand.u32 2147483647, %v105_v38  ;;  %v85_v55 = vld [vmem:[%s492_s2 + $0xa8] sm:$0xff]  ;;  %v108_v56 = vsub.f32 %v60_v48, %v84_v49  ;;  %v176_v59 = vand.u32 2147483647, %v174_v47  ;;  %v87_v3 = vld [vmem:[%s492_s2 + $0xb8] sm:$0xff] }
  0x24   :  { %v205_v20 = vrot.slane %v204_v14, 2  ;;  %v179_v62 = vsel %vm178_vm0, %v177_v50, 0.0  ;;  %v109_v63 = vsub.f32 %v61_v54, %v85_v55  ;;  %v131_v0 = vand.u32 2147483647, %v107_v51 }
  0x25   :  { %v144_v11 = vadd.f32 %v143_v5, %v121_v61  ;;  %v86_v61 = vld [vmem:[%s492_s2 + $0xb0] sm:$0xff]  ;;  %v132_v5 = vand.u32 2147483647, %v108_v56  ;;  %v180_v7 = vadd.f32 %v179_v62, %v176_v59  ;;  %v111_v8 = vsub.f32 %v63_v2, %v87_v3  ;;  %s232_s2 = sld [smem:[#allocation2 + $0x1]] }
  0x26   :  { %v206_v28 = vadd.f32 %v205_v20, %v204_v14  ;;  %v133_v9 = vand.u32 2147483647, %v109_v63 }
  0x27   :  { %v145_v17 = vadd.f32 %v144_v11, %v122_v4  ;;  %v110_v4 = vsub.f32 %v62_v60, %v86_v61  ;;  %v181_v13 = vrot.slane %v180_v7, 4  ;;  %v135_v14 = vand.u32 2147483647, %v111_v8 }
  0x28   :  { %v207_v37 = vrot.slane %v206_v28, 1  ;;  %v168_v30 = vstv %s165_s1 }
  0x29   :  { %v146_v23 = vadd.f32 %v145_v17, %v123_v10  ;;  %v134_v11 = vand.u32 2147483647, %v110_v4  ;;  %v182_v17 = vadd.f32 %v181_v13, %v180_v7 }
  0x2a   :  { %v208_v43 = vadd.f32 %v207_v37, %v206_v28 }
  0x2b   :  { %v147_v32 = vadd.f32 %v146_v23, %v124_v16  ;;  %v183_v20 = vrot.slane %v182_v17, 2 }
  0x2c   :  { %210 = vadd.xlane.f32.xlu1 %v208_v43 }
  0x2d   :  { %v148_v40 = vadd.f32 %v147_v32, %v125_v22  ;;  %v184_v23 = vadd.f32 %v183_v20, %v182_v17  ;;  %v212_v32 = vstv %s233_s13 }
  0x2f   :  { %v149_v46 = vadd.f32 %v148_v40, %v126_v31  ;;  %v185_v26 = vrot.slane %v184_v23, 1  ;;  %v190_v31 = vstv %s232_s2 }
  0x31   :  { %v150_v53 = vadd.f32 %v149_v46, %v127_v39  ;;  %v186_v28 = vadd.f32 %v185_v26, %v184_v23 }
  0x33   :  { %v151_v58 = vadd.f32 %v150_v53, %v128_v45 }
  0x35   :  { %v152_v1 = vadd.f32 %v151_v58, %v129_v52 }
  0x37   :  { %v153_v6 = vadd.f32 %v152_v1, %v130_v57 }
  0x39   :  { %v154_v10 = vadd.f32 %v153_v6, %v131_v0 }
  0x3b   :  { %v155_v12 = vadd.f32 %v154_v10, %v132_v5 }
  0x3d   :  { %v156_v15 = vadd.f32 %v155_v12, %v133_v9 }
  0x3f   :  { %v157_v16 = vadd.f32 %v156_v15, %v134_v11 }
  0x41   :  { %v158_v18 = vadd.f32 %v157_v16, %v135_v14 }
  0x43   :  { %v159_v19 = vrot.slane %v158_v18, 4 }
  0x45   :  { %v160_v21 = vadd.f32 %v159_v19, %v158_v18 }
  0x47   :  { %v161_v22 = vrot.slane %v160_v21, 2 }
  0x49   :  { %v162_v24 = vadd.f32 %v161_v22, %v160_v21 }
  0x4b   :  { %v163_v25 = vrot.slane %v162_v24, 1 }
  0x4d   :  { %v164_v27 = vadd.f32 %v163_v25, %v162_v24 }
  0x4f   :  { %166 = vadd.xlane.f32.xlu0 %v164_v27 }
  0x53   :  { %188 = vadd.xlane.f32.xlu0 %v186_v28 }
  0xb5   :  { %v211_v33 = vpop.xlane.xlu1 %210 }
  0xb6   :  { %v213_v37 = vmul.f32 %v212_v32, %v211_v33 }
  0xd8   :  { %v167_v29 = vpop.xlane.xlu0 %166 }
  0xd9   :  { %v169_v35 = vmul.f32 %v168_v30, %v167_v29 }
  0xdc   :  { %v189_v34 = vpop.xlane.xlu0 %188 }
  0xdd   :  { %v191_v36 = vmul.f32 %v190_v31, %v189_v34 }
  0xdf   :  { %v192_v38 = vadd.f32 %v191_v36, %v169_v35 }
  0xe1   :  { %v214_v39 = vadd.f32 %v213_v37, %v192_v38 }
  0xe3   :  { %216 = vst.msk [vmem:[#allocation5] sm:$0x1] %vm215_vm1, %v214_v39 }
  0xe4   :  { %259 = shalt.err (!%p256_p9)
}
  0xe5   :  { %226 = dma.vmem_to_hbm [thread:$0]  %s224_s15, 16, %s497_s7, [#allocation3]  }
  0xe6   :  { %270 = dma.done.wait [#allocation3], 16  }
  0xe7   :  { %271 = vsyncadd [#allocation3], 4294967280 }
  0xe8   :  { %230 = vsyncpa [#allocation3], 1 }
  0xe9   :  { %231 = vsyncpa [#allocation4], 1 }

</bundles_post_ra>
